<compile_context>
chip_gen: v7x
topology: tpu7x:2x2x1
jax: 0.10.0
libtpu: 0.0.40
codegen_flags: <defaults>
</compile_context>

<pallas_src>
import functools

import jax
import jax.numpy as jnp
from jax.experimental import pallas as pl
from jax.experimental.pallas import tpu as pltpu

_LANES = 128


# ---------------------------------------------------------------------------
# Module-exact forward (scalar L0, L1) — inline jnp, differentiable, fuses.
# ---------------------------------------------------------------------------
@jax.jit
def multi_task_loss(log_vars, L0, L1):
    lv0 = log_vars[0]
    lv1 = log_vars[1]
    return jnp.exp(-lv0) * L0 + lv0 + jnp.exp(-lv1) * L1 + lv1


# ---------------------------------------------------------------------------
# Fused Pallas kernel: mean(elem_loss0), mean(elem_loss1) + uncertainty weighting.
# ---------------------------------------------------------------------------
def _fused_mtl_kernel(inv_n0, inv_n1,
                      lv_ref, x0_ref, x1_ref, out_ref,
                      acc0_ref, acc1_ref):
    """lv_ref:  SMEM (2,)  f32  = [log_var0, log_var1]
       x*_ref:  VMEM (block_rows, 128) per-element loss tiles (any float dtype)
       out_ref: VMEM (1, 1) f32  = loss0 + loss1
       acc*_ref: VMEM (1, 128) f32 per-lane partial-sum accumulators."""
    step = pl.program_id(0)

    @pl.when(step == 0)
    def _():
        acc0_ref[...] = jnp.zeros_like(acc0_ref)
        acc1_ref[...] = jnp.zeros_like(acc1_ref)

    # Upcast at load (bf16 inputs halve HBM bytes on v6e/v7x); accumulate in f32.
    # Only a sublane reduce per step; cross-lane (XLU) reduce happens once below.
    acc0_ref[...] += jnp.sum(x0_ref[...].astype(jnp.float32), axis=0, keepdims=True)
    acc1_ref[...] += jnp.sum(x1_ref[...].astype(jnp.float32), axis=0, keepdims=True)

    @pl.when(step == pl.num_programs(0) - 1)
    def _():
        l0 = jnp.sum(acc0_ref[...], axis=1, keepdims=True) * inv_n0   # (1, 1) mean
        l1 = jnp.sum(acc1_ref[...], axis=1, keepdims=True) * inv_n1   # (1, 1) mean
        # Splat the SMEM scalars onto (1,1) vregs so exp stays on the EUP path.
        lv0 = jnp.full((1, 1), lv_ref[0], dtype=jnp.float32)
        lv1 = jnp.full((1, 1), lv_ref[1], dtype=jnp.float32)
        out_ref[...] = jnp.exp(-lv0) * l0 + lv0 + jnp.exp(-lv1) * l1 + lv1


@functools.partial(jax.jit, static_argnames=("max_block_rows",))
def fused_multi_task_loss(log_vars, elem_loss0, elem_loss1, *, max_block_rows=512):
    """Fused reductions + uncertainty weighting.

    elem_loss0 / elem_loss1: per-element losses from the two task heads (any shape,
    any float dtype).  Equivalent to
        multi_task_loss(log_vars, elem_loss0.mean(), elem_loss1.mean()).
    """
    n0 = elem_loss0.size
    n1 = elem_loss1.size

    def pack(x):
        # Flatten to a lane-dense (rows, 128) slab; zero padding is harmless
        # because the mean divides by the true element count.
        flat = jnp.ravel(x)
        pad = (-flat.shape[0]) % _LANES
        flat = jnp.pad(flat, (0, pad))
        return flat.reshape(-1, _LANES)

    x0 = pack(elem_loss0)
    x1 = pack(elem_loss1)
    rows = max(x0.shape[0], x1.shape[0])

    # Row-block size: multiple of 8 sublanes, capped (conservative even for v7x's
    # smaller VMEM: 512 x 128 x 4 B = 256 KiB per input per buffer).
    block_rows = max(8, min(int(max_block_rows), rows))
    block_rows -= block_rows % 8
    rows_padded = -(-rows // block_rows) * block_rows

    def pad_rows(x):
        return jnp.pad(x, ((0, rows_padded - x.shape[0]), (0, 0)))

    x0 = pad_rows(x0)
    x1 = pad_rows(x1)

    grid = (rows_padded // block_rows,)

    out = pl.pallas_call(
        functools.partial(_fused_mtl_kernel, 1.0 / float(n0), 1.0 / float(n1)),
        out_shape=jax.ShapeDtypeStruct((1, 1), jnp.float32),
        grid_spec=pltpu.PrefetchScalarGridSpec(
            num_scalar_prefetch=0,
            grid=grid,
            in_specs=[
                pl.BlockSpec(memory_space=pltpu.SMEM),                 # log_vars (2,)
                pl.BlockSpec((block_rows, _LANES), lambda i: (i, 0)),  # elem_loss0 slab
                pl.BlockSpec((block_rows, _LANES), lambda i: (i, 0)),  # elem_loss1 slab
            ],
            out_specs=pl.BlockSpec((1, 1), lambda i: (0, 0)),
            scratch_shapes=[
                pltpu.VMEM((1, _LANES), jnp.float32),
                pltpu.VMEM((1, _LANES), jnp.float32),
            ],
        ),
        compiler_params=pltpu.CompilerParams(
            dimension_semantics=("arbitrary",)),   # single axis is the reduction
    )(log_vars.astype(jnp.float32), x0, x1)
    return out[0, 0]


if __name__ == "__main__":
    task_num = 2
    # nn.Parameter(torch.zeros(task_num))
    log_vars = jnp.zeros((task_num,), dtype=jnp.float32)

    # Deterministic per-element losses from two task heads (e.g. AE reconstruction
    # + histogram loss over the same batch): shape (2, 4, 16, 16).
    key = jax.random.PRNGKey(0)
    k0, k1 = jax.random.split(key)
    elem0 = jnp.square(jax.random.normal(k0, (2, 4, 16, 16), dtype=jnp.float32))
    elem1 = jnp.square(jax.random.normal(k1, (2, 4, 16, 16), dtype=jnp.float32))

    # Fused Pallas path (small max_block_rows so the demo exercises multiple
    # grid steps of the accumulate/finalize pipeline).
    fused = fused_multi_task_loss(log_vars, elem0, elem1, max_block_rows=8)
    fused = jax.block_until_ready(fused)

    # Module-exact scalar forward (inline jnp, differentiable).
    L0 = elem0.mean()
    L1 = elem1.mean()
    scalar = multi_task_loss(log_vars, L0, L1)
    scalar = jax.block_until_ready(scalar)

    # Pure-JAX reference.
    ref = (jnp.exp(-log_vars[0]) * L0 + log_vars[0]
           + jnp.exp(-log_vars[1]) * L1 + log_vars[1])
    assert jnp.allclose(scalar, ref, rtol=1e-6, atol=1e-6), (scalar, ref)
    assert jnp.allclose(fused, ref, rtol=1e-5, atol=1e-6), (fused, ref)

    print("KERNEL_OK")
</pallas_src>

<mosaic_0001>
module attributes {stable_mosaic.version = 11 : i64} {
  func.func @_fused_mtl_kernel(%arg0: i32, %arg1: memref<2xf32, #tpu.memory_space<smem>>, %arg2: memref<8x128xf32, #tpu.memory_space<vmem>>, %arg3: memref<8x128xf32, #tpu.memory_space<vmem>>, %arg4: memref<1x1xf32, #tpu.memory_space<vmem>>, %arg5: memref<1x128xf32, #tpu.memory_space<vmem>>, %arg6: memref<1x128xf32, #tpu.memory_space<vmem>>) attributes {dimension_semantics = [#tpu.dimension_semantics<arbitrary>], iteration_bounds = array<i64: 2>, scalar_prefetch = 0 : i64, scratch_operands = 2 : i64, tpu.core_type = #tpu.core_type<tc>, window_params = [{transform_indices = @transform_0, window_bounds = array<i64: 2>}, {transform_indices = @transform_1, window_bounds = array<i64: 8, 128>}, {transform_indices = @transform_2, window_bounds = array<i64: 8, 128>}, {pipeline_mode = #tpu.pipeline_mode<synchronous>, transform_indices = @transform_3, window_bounds = array<i64: 1, 1>}]} {
    %c0_i32 = arith.constant 0 : i32
    %0 = arith.cmpi eq, %arg0, %c0_i32 : i32
    %1 = arith.extui %0 : i1 to i32
    %c0_i32_0 = arith.constant 0 : i32
    %2 = arith.cmpi ne, %1, %c0_i32_0 : i32
    scf.if %2 {
      %cst_14 = arith.constant 0.000000e+00 : f32
      %18 = vector.broadcast %cst_14 : f32 to vector<1x128xf32>
      %c0_15 = arith.constant 0 : index
      %c0_16 = arith.constant 0 : index
      %19 = vector.load %arg5[%c0_15, %c0_16] : memref<1x128xf32, #tpu.memory_space<vmem>>, vector<1x128xf32>
      tpu.vector_store %arg5[%c0_15, %c0_16], %18 {strides = array<i32>} : memref<1x128xf32, #tpu.memory_space<vmem>>, vector<1x128xf32>,
      %cst_17 = arith.constant 0.000000e+00 : f32
      %20 = vector.broadcast %cst_17 : f32 to vector<1x128xf32>
      %c0_18 = arith.constant 0 : index
      %c0_19 = arith.constant 0 : index
      %21 = vector.load %arg6[%c0_18, %c0_19] : memref<1x128xf32, #tpu.memory_space<vmem>>, vector<1x128xf32>
      tpu.vector_store %arg6[%c0_18, %c0_19], %20 {strides = array<i32>} : memref<1x128xf32, #tpu.memory_space<vmem>>, vector<1x128xf32>,
    } else {
    }
    %c0 = arith.constant 0 : index
    %c0_1 = arith.constant 0 : index
    %3 = vector.load %arg5[%c0, %c0_1] : memref<1x128xf32, #tpu.memory_space<vmem>>, vector<1x128xf32>
    %c0_2 = arith.constant 0 : index
    %c0_3 = arith.constant 0 : index
    %4 = vector.load %arg2[%c0_2, %c0_3] : memref<8x128xf32, #tpu.memory_space<vmem>>, vector<8x128xf32>
    %cst = arith.constant dense<0.000000e+00> : vector<128xf32>
    %5 = vector.multi_reduction <add>, %4, %cst [0] : vector<8x128xf32> to vector<128xf32>
    %6 = vector.shape_cast %5 : vector<128xf32> to vector<1x128xf32>
    %7 = arith.addf %3, %6 : vector<1x128xf32>
    %c0_4 = arith.constant 0 : index
    %c0_5 = arith.constant 0 : index
    %8 = vector.load %arg5[%c0_4, %c0_5] : memref<1x128xf32, #tpu.memory_space<vmem>>, vector<1x128xf32>
    tpu.vector_store %arg5[%c0_4, %c0_5], %7 {strides = array<i32>} : memref<1x128xf32, #tpu.memory_space<vmem>>, vector<1x128xf32>,
    %c0_6 = arith.constant 0 : index
    %c0_7 = arith.constant 0 : index
    %9 = vector.load %arg6[%c0_6, %c0_7] : memref<1x128xf32, #tpu.memory_space<vmem>>, vector<1x128xf32>
    %c0_8 = arith.constant 0 : index
    %c0_9 = arith.constant 0 : index
    %10 = vector.load %arg3[%c0_8, %c0_9] : memref<8x128xf32, #tpu.memory_space<vmem>>, vector<8x128xf32>
    %cst_10 = arith.constant dense<0.000000e+00> : vector<128xf32>
    %11 = vector.multi_reduction <add>, %10, %cst_10 [0] : vector<8x128xf32> to vector<128xf32>
    %12 = vector.shape_cast %11 : vector<128xf32> to vector<1x128xf32>
    %13 = arith.addf %9, %12 : vector<1x128xf32>
    %c0_11 = arith.constant 0 : index
    %c0_12 = arith.constant 0 : index
    %14 = vector.load %arg6[%c0_11, %c0_12] : memref<1x128xf32, #tpu.memory_space<vmem>>, vector<1x128xf32>
    tpu.vector_store %arg6[%c0_11, %c0_12], %13 {strides = array<i32>} : memref<1x128xf32, #tpu.memory_space<vmem>>, vector<1x128xf32>,
    %c1_i32 = arith.constant 1 : i32
    %15 = arith.cmpi eq, %arg0, %c1_i32 : i32
    %16 = arith.extui %15 : i1 to i32
    %c0_i32_13 = arith.constant 0 : i32
    %17 = arith.cmpi ne, %16, %c0_i32_13 : i32
    scf.if %17 {
      %c0_14 = arith.constant 0 : index
      %c0_15 = arith.constant 0 : index
      %18 = vector.load %arg5[%c0_14, %c0_15] : memref<1x128xf32, #tpu.memory_space<vmem>>, vector<1x128xf32>
      %cst_16 = arith.constant dense<0.000000e+00> : vector<1xf32>
      %19 = vector.multi_reduction <add>, %18, %cst_16 [1] : vector<1x128xf32> to vector<1xf32>
      %20 = vector.shape_cast %19 : vector<1xf32> to vector<1x1xf32>
      %cst_17 = arith.constant 4.8828125E-4 : f32
      %21 = vector.broadcast %cst_17 : f32 to vector<1x1xf32>
      %22 = arith.mulf %20, %21 : vector<1x1xf32>
      %c0_18 = arith.constant 0 : index
      %c0_19 = arith.constant 0 : index
      %23 = vector.load %arg6[%c0_18, %c0_19] : memref<1x128xf32, #tpu.memory_space<vmem>>, vector<1x128xf32>
      %cst_20 = arith.constant dense<0.000000e+00> : vector<1xf32>
      %24 = vector.multi_reduction <add>, %23, %cst_20 [1] : vector<1x128xf32> to vector<1xf32>
      %25 = vector.shape_cast %24 : vector<1xf32> to vector<1x1xf32>
      %cst_21 = arith.constant 4.8828125E-4 : f32
      %26 = vector.broadcast %cst_21 : f32 to vector<1x1xf32>
      %27 = arith.mulf %25, %26 : vector<1x1xf32>
      %c0_22 = arith.constant 0 : index
      %28 = memref.load %arg1[%c0_22] : memref<2xf32, #tpu.memory_space<smem>>
      %29 = vector.broadcast %28 : f32 to vector<1x1xf32>
      %c1 = arith.constant 1 : index
      %30 = memref.load %arg1[%c1] : memref<2xf32, #tpu.memory_space<smem>>
      %31 = vector.broadcast %30 : f32 to vector<1x1xf32>
      %cst_23 = arith.constant 0.000000e+00 : f32
      %32 = vector.broadcast %cst_23 : f32 to vector<1x1xf32>
      %33 = arith.subf %32, %29 : vector<1x1xf32>
      %34 = math.exp %33 : vector<1x1xf32>
      %35 = arith.mulf %34, %22 : vector<1x1xf32>
      %36 = arith.addf %35, %29 : vector<1x1xf32>
      %cst_24 = arith.constant 0.000000e+00 : f32
      %37 = vector.broadcast %cst_24 : f32 to vector<1x1xf32>
      %38 = arith.subf %37, %31 : vector<1x1xf32>
      %39 = math.exp %38 : vector<1x1xf32>
      %40 = arith.mulf %39, %27 : vector<1x1xf32>
      %41 = arith.addf %36, %40 : vector<1x1xf32>
      %42 = arith.addf %41, %31 : vector<1x1xf32>
      %c0_25 = arith.constant 0 : index
      %c0_26 = arith.constant 0 : index
      %43 = vector.load %arg4[%c0_25, %c0_26] : memref<1x1xf32, #tpu.memory_space<vmem>>, vector<1x1xf32>
      tpu.vector_store %arg4[%c0_25, %c0_26], %42 {strides = array<i32>} : memref<1x1xf32, #tpu.memory_space<vmem>>, vector<1x1xf32>,
    } else {
    }
    return
  }
  func.func @transform_0(%arg0: i32) -> i32 {
    %c0_i32 = arith.constant 0 : i32
    %c0_i32_0 = arith.constant 0 : i32
    return %c0_i32 : i32
  }
  func.func @transform_1(%arg0: i32) -> (i32, i32) {
    %c0_i32 = arith.constant 0 : i32
    %c0_i32_0 = arith.constant 0 : i32
    return %arg0, %c0_i32 : i32, i32
  }
  func.func @transform_2(%arg0: i32) -> (i32, i32) {
    %c0_i32 = arith.constant 0 : i32
    %c0_i32_0 = arith.constant 0 : i32
    return %arg0, %c0_i32 : i32, i32
  }
  func.func @transform_3(%arg0: i32) -> (i32, i32) {
    %c0_i32 = arith.constant 0 : i32
    %c0_i32_0 = arith.constant 0 : i32
    %c0_i32_1 = arith.constant 0 : i32
    return %c0_i32, %c0_i32_0 : i32, i32
  }
}

</mosaic_0001>

<bundles_post_ra>
// kernel: fused_multi_task_loss.1
= control target key start
LH: loop header
LB: loop body
LE: loop exit
PB: predicated region body
PF: predicated region fallthrough
CT: control target
= control target key end

     0   :  { %8 = vsyncpa [#allocation6], 0  ;;  %s505_s0 = inlined_call_operand.vmem [shape: f32[2], index: 0, kind: input, shape index: {}]   ;;  %s506_s1 = inlined_call_operand.vmem [shape: f32[16,128], index: 1, kind: input, shape index: {}]   ;;  %s507_s2 = inlined_call_operand.vmem [shape: f32[16,128], index: 2, kind: input, shape index: {}]   ;;  %s508_s3 = inlined_call_operand.hbm [shape: f32[1,1], index: 3, kind: output, shape index: {}]  }
   0x1   :  { %9 = vsyncpa [#allocation5], 0  ;;  %s439_s12 = smov 0  }
   0x2 LB: > { %s445_s13 = sadd.s32 4294967295, %s414_s12   ;;  %p314_p0 = scmp.ge.s32.totalorder %s414_s12, 1  ;;  %s414_s12 = sphi %s439_s12, %s15_s12  }
   0x3   : > { %p114_p1 = scmp.lt.s32.totalorder %s414_s12, 3  ;;  %s127_s16 = sshll.u32 %s505_s0, 4  ;;  %s128_s16 = int_to_ptr.vmem [resolvable:$true] %s127_s16 }
   0x4   : > { %p340_p4 = scmp.eq.s32.totalorder %s445_s13, 0  ;;  %s359_s18 = scalar_lea.vmem %s128_s16, 16 }
   0x5   : > { %p453_p3 = pnand %p314_p0, %p114_p1  ;;  %p360_p7 = scmp.ne.s32.totalorder %s128_s16, %s359_s18 }
   0x6   : > { %p367_p11 = scmp.lt.s32.totalorder %s128_s16, %s128_s16  ;;  %p368_p12 = scmp.lt.s32.totalorder %s359_s18, %s359_s18 }
   0x7   : > { %p336_p5 = pneg %p453_p3 }
   0x8   : > { %p369_p13 = por %p368_p12, %p367_p11 }
   0x9   : > { %p337_p6 = pnand %p340_p4, %p336_p5 }
   0xb   : > { %p361_p8 = pneg %p337_p6 }
   0xd   : > { %p362_p9 = pnand %p361_p8, %p360_p7 }
   0xf   : > { %p363_p10 = pneg %p362_p9 }
  0x11   : > { %p370_p2 = pnand %p369_p13, %p363_p10 }
  0x13   : > { %373 = shalt.err (!%p370_p2)
}
  0x14   : > { %s416_s19 = smov [#allocation4]   ;;  %154 = sbr.rel (%p453_p3) target bundleno = 244 (0xf4), region = 32 }
  0x15   : > { %339 = dma.vmem_to_smem (!%p337_p6), %s128_s16, 16, %s416_s19, [#allocation6]  }
  0x1b   : > { %405 = dma.done.wait (%p340_p4), [#allocation6], 16  }
  0x1c   : > { %407 = vsyncadd (%p340_p4), [#allocation6], 4294967280 }
  0x1d   : > { %160 = sfence }
  0x1e   : > { %p177_p0 = scmp.lt.s32.totalorder %s445_s13, 1  ;;  %p510_p1 = scmp.ne.s32.totalorder %s445_s13, 0 }
  0x1f   : > { %v417_v0 = vmov (!%p510_p1), 0.0  }
  0x20   : > { %s178_s20 = scalar_select %p177_p0, %s445_s13, 1 }
  0x21   : > { %188 = sbr.rel (%p510_p1) target bundleno = 40 (0x28), region = 40  ;;  %189 = vst [vmem:[#allocation2] sm:$0x1] (!%p510_p1), %v417_v0  ;;  %190 = vst [vmem:[#allocation3] sm:$0x1] (!%p510_p1), %v417_v0 }
  0x22   : > { %s319_s21 = sshll.u32 %s178_s20, 3 }
  0x23   : > { %s180_s24 = scalar_lea.vmem %s506_s1, %s319_s21  ;;  %s184_s27 = scalar_lea.vmem %s507_s2, %s319_s21 }
  0x28 PF: > { %v192_v1 = vld [vmem:[%s180_s24] sm:$0xff]  ;;  %p322_p2 = scmp.ne.s32.totalorder %s445_s13, 1 }
  0x29   : > { %v193_v2 = vrot.slane %v192_v1, 4  ;;  %v202_v3 = vld [vmem:[%s184_s27] sm:$0xff]  ;;  %vm216_vm0 = vcmask (!%p322_p2), 1040384   ;;  %s226_s28 = sld [smem:[#allocation4]] (!%p322_p2)  ;;  %s323_s29 = sld [smem:[#allocation4 + $0x1]] (!%p322_p2)  ;;  %vm241_vm1 = vcmask (!%p322_p2), 0  }
  0x2a   : > { %v203_v4 = vrot.slane %v202_v3, 4  ;;  %v191_v12 = vld [vmem:[#allocation2] sm:$0x1]  ;;  %v201_v15 = vld [vmem:[#allocation3] sm:$0x1] }
  0x2b   : > { %v194_v5 = vadd.f32 %v193_v2, %v192_v1 }
  0x2c   : > { %v204_v6 = vadd.f32 %v203_v4, %v202_v3 }
  0x2d   : > { %v195_v7 = vrot.slane %v194_v5, 2 }
  0x2e   : > { %v205_v8 = vrot.slane %v204_v6, 2 }
  0x2f   : > { %v196_v9 = vadd.f32 %v195_v7, %v194_v5  ;;  %v227_v23 = vstv (!%p322_p2), %s226_s28  ;;  %v229_v25 = vstv (!%p322_p2), %s323_s29 }
  0x30   : > { %v206_v10 = vadd.f32 %v205_v8, %v204_v6  ;;  %v230_v24 = vsub.f32 (!%p322_p2), 0.0, %v227_v23  ;;  %v235_v27 = vsub.f32 (!%p322_p2), 0.0, %v229_v25 }
  0x31   : > { %v197_v11 = vrot.slane %v196_v9, 1 }
  0x32   : > { %v207_v13 = vrot.slane %v206_v10, 1  ;;  %214 = sbr.rel (%p322_p2) target bundleno = 219 (0xdb), region = 44  ;;  %v231_v26 = vmul.f32 (!%p322_p2), 1.442695, %v230_v24  ;;  %v236_v28 = vmul.f32 (!%p322_p2), 1.442695, %v235_v27 }
  0x33   : > { %v198_v14 = vadd.f32 %v197_v11, %v196_v9 }
  0x34   : > { %v208_v16 = vadd.f32 %v207_v13, %v206_v10  ;;  %355 = vpow2.f32 (!%p322_p2), %v231_v26 }
  0x35   : > { %v199_v17 = vadd.f32 %v198_v14, %v191_v12  ;;  %357 = vpow2.f32 (!%p322_p2), %v236_v28 }
  0x36   : > { %v209_v18 = vadd.f32 %v208_v16, %v201_v15 }
  0x37   : > { %200 = vst [vmem:[#allocation2] sm:$0x1] %v199_v17 }
  0x38   : > { %210 = vst [vmem:[#allocation3] sm:$0x1] %v209_v18 }
  0x3e   : > { %v215_v19 = vld [vmem:[#allocation2] sm:$0x1]  ;;  %v356_v29 = vpop.eup %355 }
  0x3f   : > { %v221_v20 = vld [vmem:[#allocation3] sm:$0x1]  ;;  %v217_v21 = vsel %vm216_vm0, %v215_v19, 0.0  ;;  %v358_v33 = vpop.eup %357 }
  0x40   : > { %218 = vadd.xlane.f32.xlu0 %v217_v21  ;;  %v222_v22 = vsel %vm216_vm0, %v221_v20, 0.0 }
  0x44   : > { %223 = vadd.xlane.f32.xlu0 %v222_v22 }
  0xcd   : > { %v219_v30 = vpop.xlane.xlu0 %218 }
  0xce   : > { %v220_v31 = vmul.f32 0.00048828125, %v219_v30 }
  0xd0   : > { %v233_v32 = vmul.f32 %v356_v29, %v220_v31 }
  0xd1   : > { %v224_v34 = vpop.xlane.xlu0 %223 }
  0xd2   : > { %v225_v35 = vmul.f32 0.00048828125, %v224_v34  ;;  %v234_v36 = vadd.f32 %v233_v32, %v227_v23 }
  0xd4   : > { %v238_v37 = vmul.f32 %v358_v33, %v225_v35 }
  0xd6   : > { %v239_v38 = vadd.f32 %v238_v37, %v234_v36 }
  0xd8   : > { %v240_v39 = vadd.f32 %v239_v38, %v229_v25 }
  0xda   : > { %242 = vst.msk [vmem:[#allocation7] sm:$0x1] %vm241_vm1, %v240_v39 }
  0xdb PF: > { %p342_p3 = scmp.eq.s32.totalorder %s445_s13, 1  ;;  %s418_s30 = smov [#allocation7]  }
  0xdc   : > { %s250_s4 = sshll.u32 %s418_s30, 4  ;;  %s251_s4 = int_to_ptr.vmem [resolvable:$true] %s250_s4 }
  0xdd   : > { %s374_s5 = scalar_lea.vmem %s251_s4, 16  ;;  %s380_s6 = scalar_lea.vmem %s251_s4, 32 }
  0xde   : > { %p375_p4 = scmp.ne.s32.totalorder %s251_s4, %s374_s5  ;;  %p381_p7 = scmp.lt.s32.totalorder %s251_s4, %s251_s4 }
  0xdf   : > { %p382_p8 = scmp.lt.s32.totalorder %s380_s6, %s374_s5 }
  0xe0   : > { %p376_p5 = pnand %p375_p4, %p342_p3 }
  0xe1   : > { %p383_p9 = por %p382_p8, %p381_p7 }
  0xe2   : > { %p377_p6 = pneg %p376_p5 }
  0xe4   : > { %p384_p10 = pnand %p383_p9, %p377_p6 }
  0xe6   : > { %387 = shalt.err (!%p384_p10)
}
  0xe7   : > { %s388_s9 = scalar_lea.hbm %s508_s3, 16 }
  0xe8   : > { %p389_p11 = scmp.ne.s32.totalorder %s508_s3, %s388_s9  ;;  %p394_p0 = scmp.lt.u32.totalorder %s388_s9, %s508_s3 }
  0xea   : > { %p390_p12 = pnand %p389_p11, %p342_p3 }
  0xec   : > { %p391_p13 = pneg %p390_p12 }
  0xee   : > { %p396_p1 = pnand %p394_p0, %p391_p13 }
  0xf0   : > { %399 = shalt.err (!%p396_p1)
}
  0xf1   : > { %333 = dma.vmem_to_hbm [thread:$0]  (%p342_p3), %s251_s4, 16, %s508_s3, [#allocation5]  }
  0xf2   : > { %409 = dma.done.wait (%p342_p3), [#allocation5], 16  }
  0xf3   : > { %411 = vsyncadd (%p342_p3), [#allocation5], 4294967280 }
  0xf4 PF: > { %s15_s12 = sadd.s32 1, %s414_s12  }
  0xf5   : > { %p12_p2 = scmp.ge.s32.totalorder %s15_s12, 4  }
  0xf7   :  { %14 = sbr.rel (!%p12_p2) target bundleno = 2 (0x2), region = 75 }
  0xfe   :  { %263 = vsyncpa [#allocation5], 1 }
  0xff   :  { %265 = vsyncpa [#allocation5 + $0x1], 1 }
 0x100   :  { %266 = vsyncpa [#allocation6], 1 }
 0x101   :  { %268 = vsyncpa [#allocation6 + $0x1], 1 }

</bundles_post_ra>
